<compile_context>
chip_gen: v7x
topology: tpu7x:2x2x1
jax: 0.10.0
libtpu: 0.0.40
codegen_flags: <defaults>
</compile_context>

<pallas_src>
import jax
import jax.numpy as jnp
from jax import lax
from jax.experimental import pallas as pl
from jax.experimental.pallas import tpu as pltpu


def _lstm_fc_kernel(x_ref, wih_ref, whh_ref, b_ref,
                    fcw_ref, fcb_ref, ow_ref, ob_ref,
                    out_ref, gx_ref):
    """Full LSTM recurrence over the sequence + fc + output head.

    x_ref   : (seq, E)    embedded tokens
    wih_ref : (E, 4H)     W_ih^T, gate order [i, f, g, o]
    whh_ref : (H, 4H)     W_hh^T
    b_ref   : (1, 4H)     b_ih + b_hh
    fcw_ref : (H, F)      fc weight^T
    fcb_ref : (1, F)      fc bias
    ow_ref  : (F, O)      output weight^T
    ob_ref  : (1, O)      output bias
    out_ref : (1, O)      result (logits for the single "batch" element)
    gx_ref  : (seq, 4H)   VMEM scratch for the hoisted input projection
    """
    seq = x_ref.shape[0]
    hidden = whh_ref.shape[0]

    whh = whh_ref[...]

    # Hoisted input-side projection: one M=seq MXU matmul, bias folded in.
    gx_ref[...] = (jnp.dot(x_ref[...], wih_ref[...],
                           preferred_element_type=jnp.float32)
                   + b_ref[...])                                  # (seq, 4H)

    def step(t, carry):
        h, c = carry
        # Only the recurrent matmul remains on the serial critical path.
        gates = gx_ref[pl.ds(t, 1), :] + jnp.dot(
            h, whh, preferred_element_type=jnp.float32)           # (1, 4H)
        # Activate the full lane-dense (1, 4H) vreg once on the EUP, then
        # extract the [i, f, g, o] blocks (PyTorch gate order).
        sig = jax.nn.sigmoid(gates)
        th = jnp.tanh(gates)
        i = sig[:, 0 * hidden:1 * hidden]
        f = sig[:, 1 * hidden:2 * hidden]
        g = th[:, 2 * hidden:3 * hidden]
        o = sig[:, 3 * hidden:4 * hidden]
        c_new = f * c + i * g
        h_new = o * jnp.tanh(c_new)
        return (h_new, c_new)

    h0 = jnp.zeros((1, hidden), jnp.float32)
    c0 = jnp.zeros((1, hidden), jnp.float32)
    # seq is static -> fully unroll so the scheduler sees across timesteps.
    h_last, _ = lax.fori_loop(0, seq, step, (h0, c0), unroll=True)

    fc_out = jnp.dot(h_last, fcw_ref[...],
                     preferred_element_type=jnp.float32) + fcb_ref[...]
    out_ref[...] = jnp.dot(fc_out, ow_ref[...],
                           preferred_element_type=jnp.float32) + ob_ref[...]


def text_lstm_forward(tokens, params):
    """Pure-JAX glue (embedding gather) + Pallas kernel for the hot path."""
    x_emb = jnp.take(params["embedding"], tokens, axis=0)        # (seq, E) f32
    seq, _ = x_emb.shape
    hidden = params["whh_t"].shape[0]
    output_dim = params["ob"].shape[-1]

    vmem = pl.BlockSpec(memory_space=pltpu.MemorySpace.VMEM)
    kernel = pl.pallas_call(
        _lstm_fc_kernel,
        out_shape=jax.ShapeDtypeStruct((1, output_dim), jnp.float32),
        in_specs=[vmem] * 8,
        out_specs=vmem,
        scratch_shapes=[pltpu.VMEM((seq, 4 * hidden), jnp.float32)],
    )
    return kernel(
        x_emb,
        params["wih_t"], params["whh_t"], params["b"],
        params["fcw_t"], params["fcb"],
        params["ow_t"], params["ob"],
    )


def make_params(key, vocab_size, embed_dim, hidden_dim, fc_dim, output_dim):
    ks = jax.random.split(key, 9)
    scale = 0.1
    emb = jax.random.normal(ks[0], (vocab_size, embed_dim), jnp.float32)
    # PyTorch LSTM weights: weight_ih (4H, E), weight_hh (4H, H), biases (4H,)
    w_ih = scale * jax.random.normal(ks[1], (4 * hidden_dim, embed_dim), jnp.float32)
    w_hh = scale * jax.random.normal(ks[2], (4 * hidden_dim, hidden_dim), jnp.float32)
    b_ih = scale * jax.random.normal(ks[3], (4 * hidden_dim,), jnp.float32)
    b_hh = scale * jax.random.normal(ks[4], (4 * hidden_dim,), jnp.float32)
    fc_w = scale * jax.random.normal(ks[5], (fc_dim, hidden_dim), jnp.float32)
    fc_b = scale * jax.random.normal(ks[6], (fc_dim,), jnp.float32)
    o_w = scale * jax.random.normal(ks[7], (output_dim, fc_dim), jnp.float32)
    o_b = scale * jax.random.normal(ks[8], (output_dim,), jnp.float32)
    return {
        "embedding": emb,
        "wih_t": w_ih.T,                      # (E, 4H)
        "whh_t": w_hh.T,                      # (H, 4H)
        "b": (b_ih + b_hh)[None, :],          # (1, 4H)
        "fcw_t": fc_w.T,                      # (H, F)
        "fcb": fc_b[None, :],                 # (1, F)
        "ow_t": o_w.T,                        # (F, O)
        "ob": o_b[None, :],                   # (1, O)
    }


def reference_forward(tokens, params):
    """Pure-JAX reference matching torch.nn.LSTM semantics (sanity check)."""
    x_emb = jnp.take(params["embedding"], tokens, axis=0)
    H = params["whh_t"].shape[0]
    h = jnp.zeros((1, H), jnp.float32)
    c = jnp.zeros((1, H), jnp.float32)
    for t in range(x_emb.shape[0]):
        gates = x_emb[t:t + 1] @ params["wih_t"] + h @ params["whh_t"] + params["b"]
        i = jax.nn.sigmoid(gates[:, 0 * H:1 * H])
        f = jax.nn.sigmoid(gates[:, 1 * H:2 * H])
        g = jnp.tanh(gates[:, 2 * H:3 * H])
        o = jax.nn.sigmoid(gates[:, 3 * H:4 * H])
        c = f * c + i * g
        h = o * jnp.tanh(c)
    fc = h @ params["fcw_t"] + params["fcb"]
    return fc @ params["ow_t"] + params["ob"]


if __name__ == "__main__":
    vocab_size, embed_dim, hidden_dim, fc_dim, output_dim = 50, 16, 32, 32, 8
    seq_len = 8

    key = jax.random.PRNGKey(0)
    k_par, k_tok = jax.random.split(key)
    params = make_params(k_par, vocab_size, embed_dim, hidden_dim, fc_dim, output_dim)
    tokens = jax.random.randint(k_tok, (seq_len,), 0, vocab_size, dtype=jnp.int32)

    out = text_lstm_forward(tokens, params)
    out = jax.block_until_ready(out)

    ref = reference_forward(tokens, params)
    assert out.shape == (1, output_dim)
    assert jnp.allclose(out, ref, atol=1e-5, rtol=1e-5)

    print("KERNEL_OK")
</pallas_src>

<mosaic_0001>
module attributes {stable_mosaic.version = 11 : i64} {
  func.func @_lstm_fc_kernel(%arg0: memref<8x16xf32, #tpu.memory_space<vmem>>, %arg1: memref<16x128xf32, #tpu.memory_space<vmem>>, %arg2: memref<32x128xf32, #tpu.memory_space<vmem>>, %arg3: memref<1x128xf32, #tpu.memory_space<vmem>>, %arg4: memref<32x32xf32, #tpu.memory_space<vmem>>, %arg5: memref<1x32xf32, #tpu.memory_space<vmem>>, %arg6: memref<32x8xf32, #tpu.memory_space<vmem>>, %arg7: memref<1x8xf32, #tpu.memory_space<vmem>>, %arg8: memref<1x8xf32, #tpu.memory_space<vmem>>, %arg9: memref<8x128xf32, #tpu.memory_space<vmem>>) attributes {dimension_semantics = [], scalar_prefetch = 0 : i64, scratch_operands = 1 : i64, tpu.core_type = #tpu.core_type<tc>} {
    %c0 = arith.constant 0 : index
    %c0_0 = arith.constant 0 : index
    %0 = vector.load %arg2[%c0, %c0_0] : memref<32x128xf32, #tpu.memory_space<vmem>>, vector<32x128xf32>
    %c0_1 = arith.constant 0 : index
    %c0_2 = arith.constant 0 : index
    %1 = vector.load %arg0[%c0_1, %c0_2] : memref<8x16xf32, #tpu.memory_space<vmem>>, vector<8x16xf32>
    %c0_3 = arith.constant 0 : index
    %c0_4 = arith.constant 0 : index
    %2 = vector.load %arg1[%c0_3, %c0_4] : memref<16x128xf32, #tpu.memory_space<vmem>>, vector<16x128xf32>
    %cst = arith.constant dense<0.000000e+00> : vector<8x128xf32>
    %3 = tpu.matmul %1, %2, %cst {dimension_numbers = #tpu.dot_dimension_numbers<[1], [0], [0], [1], [0, 0, 1, 1], [], []>} : vector<8x16xf32>, vector<16x128xf32>, vector<8x128xf32> -> vector<8x128xf32>
    %c0_5 = arith.constant 0 : index
    %c0_6 = arith.constant 0 : index
    %4 = vector.load %arg3[%c0_5, %c0_6] : memref<1x128xf32, #tpu.memory_space<vmem>>, vector<1x128xf32>
    %5 = vector.broadcast %4 : vector<1x128xf32> to vector<8x128xf32>
    %6 = arith.addf %3, %5 : vector<8x128xf32>
    %c0_7 = arith.constant 0 : index
    %c0_8 = arith.constant 0 : index
    %7 = vector.load %arg9[%c0_7, %c0_8] : memref<8x128xf32, #tpu.memory_space<vmem>>, vector<8x128xf32>
    tpu.vector_store %arg9[%c0_7, %c0_8], %6 {strides = array<i32>} : memref<8x128xf32, #tpu.memory_space<vmem>>, vector<8x128xf32>,
    %cst_9 = arith.constant 0.000000e+00 : f32
    %8 = vector.broadcast %cst_9 : f32 to vector<1x32xf32>
    %cst_10 = arith.constant 0.000000e+00 : f32
    %9 = vector.broadcast %cst_10 : f32 to vector<1x32xf32>
    %c0_i32 = arith.constant 0 : i32
    %10 = arith.index_cast %c0_i32 : i32 to index
    %c0_11 = arith.constant 0 : index
    %11 = vector.load %arg9[%10, %c0_11] : memref<8x128xf32, #tpu.memory_space<vmem>>, vector<1x128xf32>
    %cst_12 = arith.constant dense<0.000000e+00> : vector<1x128xf32>
    %12 = tpu.matmul %8, %0, %cst_12 {dimension_numbers = #tpu.dot_dimension_numbers<[1], [0], [0], [1], [0, 0, 1, 1], [], []>} : vector<1x32xf32>, vector<32x128xf32>, vector<1x128xf32> -> vector<1x128xf32>
    %13 = arith.addf %11, %12 : vector<1x128xf32>
    %14 = arith.negf %13 : vector<1x128xf32>
    %15 = math.exp %14 : vector<1x128xf32>
    %cst_13 = arith.constant 1.000000e+00 : f32
    %16 = vector.broadcast %cst_13 : f32 to vector<1x128xf32>
    %17 = arith.addf %16, %15 : vector<1x128xf32>
    %18 = arith.divf %16, %17 : vector<1x128xf32>
    %19 = math.tanh %13 : vector<1x128xf32>
    %20 = vector.extract_strided_slice %18 {offsets = [0, 0], sizes = [1, 32], strides = [1, 1]} : vector<1x128xf32> to vector<1x32xf32>
    %21 = vector.extract_strided_slice %18 {offsets = [0, 32], sizes = [1, 32], strides = [1, 1]} : vector<1x128xf32> to vector<1x32xf32>
    %22 = vector.extract_strided_slice %19 {offsets = [0, 64], sizes = [1, 32], strides = [1, 1]} : vector<1x128xf32> to vector<1x32xf32>
    %23 = vector.extract_strided_slice %18 {offsets = [0, 96], sizes = [1, 32], strides = [1, 1]} : vector<1x128xf32> to vector<1x32xf32>
    %24 = arith.mulf %21, %9 : vector<1x32xf32>
    %25 = arith.mulf %20, %22 : vector<1x32xf32>
    %26 = arith.addf %24, %25 : vector<1x32xf32>
    %27 = math.tanh %26 : vector<1x32xf32>
    %28 = arith.mulf %23, %27 : vector<1x32xf32>
    %c1_i32 = arith.constant 1 : i32
    %29 = arith.index_cast %c1_i32 : i32 to index
    %c0_14 = arith.constant 0 : index
    %30 = vector.load %arg9[%29, %c0_14] : memref<8x128xf32, #tpu.memory_space<vmem>>, vector<1x128xf32>
    %cst_15 = arith.constant dense<0.000000e+00> : vector<1x128xf32>
    %31 = tpu.matmul %28, %0, %cst_15 {dimension_numbers = #tpu.dot_dimension_numbers<[1], [0], [0], [1], [0, 0, 1, 1], [], []>} : vector<1x32xf32>, vector<32x128xf32>, vector<1x128xf32> -> vector<1x128xf32>
    %32 = arith.addf %30, %31 : vector<1x128xf32>
    %33 = arith.negf %32 : vector<1x128xf32>
    %34 = math.exp %33 : vector<1x128xf32>
    %cst_16 = arith.constant 1.000000e+00 : f32
    %35 = vector.broadcast %cst_16 : f32 to vector<1x128xf32>
    %36 = arith.addf %35, %34 : vector<1x128xf32>
    %37 = arith.divf %35, %36 : vector<1x128xf32>
    %38 = math.tanh %32 : vector<1x128xf32>
    %39 = vector.extract_strided_slice %37 {offsets = [0, 0], sizes = [1, 32], strides = [1, 1]} : vector<1x128xf32> to vector<1x32xf32>
    %40 = vector.extract_strided_slice %37 {offsets = [0, 32], sizes = [1, 32], strides = [1, 1]} : vector<1x128xf32> to vector<1x32xf32>
    %41 = vector.extract_strided_slice %38 {offsets = [0, 64], sizes = [1, 32], strides = [1, 1]} : vector<1x128xf32> to vector<1x32xf32>
    %42 = vector.extract_strided_slice %37 {offsets = [0, 96], sizes = [1, 32], strides = [1, 1]} : vector<1x128xf32> to vector<1x32xf32>
    %43 = arith.mulf %40, %26 : vector<1x32xf32>
    %44 = arith.mulf %39, %41 : vector<1x32xf32>
    %45 = arith.addf %43, %44 : vector<1x32xf32>
    %46 = math.tanh %45 : vector<1x32xf32>
    %47 = arith.mulf %42, %46 : vector<1x32xf32>
    %c2_i32 = arith.constant 2 : i32
    %48 = arith.index_cast %c2_i32 : i32 to index
    %c0_17 = arith.constant 0 : index
    %49 = vector.load %arg9[%48, %c0_17] : memref<8x128xf32, #tpu.memory_space<vmem>>, vector<1x128xf32>
    %cst_18 = arith.constant dense<0.000000e+00> : vector<1x128xf32>
    %50 = tpu.matmul %47, %0, %cst_18 {dimension_numbers = #tpu.dot_dimension_numbers<[1], [0], [0], [1], [0, 0, 1, 1], [], []>} : vector<1x32xf32>, vector<32x128xf32>, vector<1x128xf32> -> vector<1x128xf32>
    %51 = arith.addf %49, %50 : vector<1x128xf32>
    %52 = arith.negf %51 : vector<1x128xf32>
    %53 = math.exp %52 : vector<1x128xf32>
    %cst_19 = arith.constant 1.000000e+00 : f32
    %54 = vector.broadcast %cst_19 : f32 to vector<1x128xf32>
    %55 = arith.addf %54, %53 : vector<1x128xf32>
    %56 = arith.divf %54, %55 : vector<1x128xf32>
    %57 = math.tanh %51 : vector<1x128xf32>
    %58 = vector.extract_strided_slice %56 {offsets = [0, 0], sizes = [1, 32], strides = [1, 1]} : vector<1x128xf32> to vector<1x32xf32>
    %59 = vector.extract_strided_slice %56 {offsets = [0, 32], sizes = [1, 32], strides = [1, 1]} : vector<1x128xf32> to vector<1x32xf32>
    %60 = vector.extract_strided_slice %57 {offsets = [0, 64], sizes = [1, 32], strides = [1, 1]} : vector<1x128xf32> to vector<1x32xf32>
    %61 = vector.extract_strided_slice %56 {offsets = [0, 96], sizes = [1, 32], strides = [1, 1]} : vector<1x128xf32> to vector<1x32xf32>
    %62 = arith.mulf %59, %45 : vector<1x32xf32>
    %63 = arith.mulf %58, %60 : vector<1x32xf32>
    %64 = arith.addf %62, %63 : vector<1x32xf32>
    %65 = math.tanh %64 : vector<1x32xf32>
    %66 = arith.mulf %61, %65 : vector<1x32xf32>
    %c3_i32 = arith.constant 3 : i32
    %67 = arith.index_cast %c3_i32 : i32 to index
    %c0_20 = arith.constant 0 : index
    %68 = vector.load %arg9[%67, %c0_20] : memref<8x128xf32, #tpu.memory_space<vmem>>, vector<1x128xf32>
    %cst_21 = arith.constant dense<0.000000e+00> : vector<1x128xf32>
    %69 = tpu.matmul %66, %0, %cst_21 {dimension_numbers = #tpu.dot_dimension_numbers<[1], [0], [0], [1], [0, 0, 1, 1], [], []>} : vector<1x32xf32>, vector<32x128xf32>, vector<1x128xf32> -> vector<1x128xf32>
    %70 = arith.addf %68, %69 : vector<1x128xf32>
    %71 = arith.negf %70 : vector<1x128xf32>
    %72 = math.exp %71 : vector<1x128xf32>
    %cst_22 = arith.constant 1.000000e+00 : f32
    %73 = vector.broadcast %cst_22 : f32 to vector<1x128xf32>
    %74 = arith.addf %73, %72 : vector<1x128xf32>
    %75 = arith.divf %73, %74 : vector<1x128xf32>
    %76 = math.tanh %70 : vector<1x128xf32>
    %77 = vector.extract_strided_slice %75 {offsets = [0, 0], sizes = [1, 32], strides = [1, 1]} : vector<1x128xf32> to vector<1x32xf32>
    %78 = vector.extract_strided_slice %75 {offsets = [0, 32], sizes = [1, 32], strides = [1, 1]} : vector<1x128xf32> to vector<1x32xf32>
    %79 = vector.extract_strided_slice %76 {offsets = [0, 64], sizes = [1, 32], strides = [1, 1]} : vector<1x128xf32> to vector<1x32xf32>
    %80 = vector.extract_strided_slice %75 {offsets = [0, 96], sizes = [1, 32], strides = [1, 1]} : vector<1x128xf32> to vector<1x32xf32>
    %81 = arith.mulf %78, %64 : vector<1x32xf32>
    %82 = arith.mulf %77, %79 : vector<1x32xf32>
    %83 = arith.addf %81, %82 : vector<1x32xf32>
    %84 = math.tanh %83 : vector<1x32xf32>
    %85 = arith.mulf %80, %84 : vector<1x32xf32>
    %c4_i32 = arith.constant 4 : i32
    %86 = arith.index_cast %c4_i32 : i32 to index
    %c0_23 = arith.constant 0 : index
    %87 = vector.load %arg9[%86, %c0_23] : memref<8x128xf32, #tpu.memory_space<vmem>>, vector<1x128xf32>
    %cst_24 = arith.constant dense<0.000000e+00> : vector<1x128xf32>
    %88 = tpu.matmul %85, %0, %cst_24 {dimension_numbers = #tpu.dot_dimension_numbers<[1], [0], [0], [1], [0, 0, 1, 1], [], []>} : vector<1x32xf32>, vector<32x128xf32>, vector<1x128xf32> -> vector<1x128xf32>
    %89 = arith.addf %87, %88 : vector<1x128xf32>
    %90 = arith.negf %89 : vector<1x128xf32>
    %91 = math.exp %90 : vector<1x128xf32>
    %cst_25 = arith.constant 1.000000e+00 : f32
    %92 = vector.broadcast %cst_25 : f32 to vector<1x128xf32>
    %93 = arith.addf %92, %91 : vector<1x128xf32>
    %94 = arith.divf %92, %93 : vector<1x128xf32>
    %95 = math.tanh %89 : vector<1x128xf32>
    %96 = vector.extract_strided_slice %94 {offsets = [0, 0], sizes = [1, 32], strides = [1, 1]} : vector<1x128xf32> to vector<1x32xf32>
    %97 = vector.extract_strided_slice %94 {offsets = [0, 32], sizes = [1, 32], strides = [1, 1]} : vector<1x128xf32> to vector<1x32xf32>
    %98 = vector.extract_strided_slice %95 {offsets = [0, 64], sizes = [1, 32], strides = [1, 1]} : vector<1x128xf32> to vector<1x32xf32>
    %99 = vector.extract_strided_slice %94 {offsets = [0, 96], sizes = [1, 32], strides = [1, 1]} : vector<1x128xf32> to vector<1x32xf32>
    %100 = arith.mulf %97, %83 : vector<1x32xf32>
    %101 = arith.mulf %96, %98 : vector<1x32xf32>
    %102 = arith.addf %100, %101 : vector<1x32xf32>
    %103 = math.tanh %102 : vector<1x32xf32>
    %104 = arith.mulf %99, %103 : vector<1x32xf32>
    %c5_i32 = arith.constant 5 : i32
    %105 = arith.index_cast %c5_i32 : i32 to index
    %c0_26 = arith.constant 0 : index
    %106 = vector.load %arg9[%105, %c0_26] : memref<8x128xf32, #tpu.memory_space<vmem>>, vector<1x128xf32>
    %cst_27 = arith.constant dense<0.000000e+00> : vector<1x128xf32>
    %107 = tpu.matmul %104, %0, %cst_27 {dimension_numbers = #tpu.dot_dimension_numbers<[1], [0], [0], [1], [0, 0, 1, 1], [], []>} : vector<1x32xf32>, vector<32x128xf32>, vector<1x128xf32> -> vector<1x128xf32>
    %108 = arith.addf %106, %107 : vector<1x128xf32>
    %109 = arith.negf %108 : vector<1x128xf32>
    %110 = math.exp %109 : vector<1x128xf32>
    %cst_28 = arith.constant 1.000000e+00 : f32
    %111 = vector.broadcast %cst_28 : f32 to vector<1x128xf32>
    %112 = arith.addf %111, %110 : vector<1x128xf32>
    %113 = arith.divf %111, %112 : vector<1x128xf32>
    %114 = math.tanh %108 : vector<1x128xf32>
    %115 = vector.extract_strided_slice %113 {offsets = [0, 0], sizes = [1, 32], strides = [1, 1]} : vector<1x128xf32> to vector<1x32xf32>
    %116 = vector.extract_strided_slice %113 {offsets = [0, 32], sizes = [1, 32], strides = [1, 1]} : vector<1x128xf32> to vector<1x32xf32>
    %117 = vector.extract_strided_slice %114 {offsets = [0, 64], sizes = [1, 32], strides = [1, 1]} : vector<1x128xf32> to vector<1x32xf32>
    %118 = vector.extract_strided_slice %113 {offsets = [0, 96], sizes = [1, 32], strides = [1, 1]} : vector<1x128xf32> to vector<1x32xf32>
    %119 = arith.mulf %116, %102 : vector<1x32xf32>
    %120 = arith.mulf %115, %117 : vector<1x32xf32>
    %121 = arith.addf %119, %120 : vector<1x32xf32>
    %122 = math.tanh %121 : vector<1x32xf32>
    %123 = arith.mulf %118, %122 : vector<1x32xf32>
    %c6_i32 = arith.constant 6 : i32
    %124 = arith.index_cast %c6_i32 : i32 to index
    %c0_29 = arith.constant 0 : index
    %125 = vector.load %arg9[%124, %c0_29] : memref<8x128xf32, #tpu.memory_space<vmem>>, vector<1x128xf32>
    %cst_30 = arith.constant dense<0.000000e+00> : vector<1x128xf32>
    %126 = tpu.matmul %123, %0, %cst_30 {dimension_numbers = #tpu.dot_dimension_numbers<[1], [0], [0], [1], [0, 0, 1, 1], [], []>} : vector<1x32xf32>, vector<32x128xf32>, vector<1x128xf32> -> vector<1x128xf32>
    %127 = arith.addf %125, %126 : vector<1x128xf32>
    %128 = arith.negf %127 : vector<1x128xf32>
    %129 = math.exp %128 : vector<1x128xf32>
    %cst_31 = arith.constant 1.000000e+00 : f32
    %130 = vector.broadcast %cst_31 : f32 to vector<1x128xf32>
    %131 = arith.addf %130, %129 : vector<1x128xf32>
    %132 = arith.divf %130, %131 : vector<1x128xf32>
    %133 = math.tanh %127 : vector<1x128xf32>
    %134 = vector.extract_strided_slice %132 {offsets = [0, 0], sizes = [1, 32], strides = [1, 1]} : vector<1x128xf32> to vector<1x32xf32>
    %135 = vector.extract_strided_slice %132 {offsets = [0, 32], sizes = [1, 32], strides = [1, 1]} : vector<1x128xf32> to vector<1x32xf32>
    %136 = vector.extract_strided_slice %133 {offsets = [0, 64], sizes = [1, 32], strides = [1, 1]} : vector<1x128xf32> to vector<1x32xf32>
    %137 = vector.extract_strided_slice %132 {offsets = [0, 96], sizes = [1, 32], strides = [1, 1]} : vector<1x128xf32> to vector<1x32xf32>
    %138 = arith.mulf %135, %121 : vector<1x32xf32>
    %139 = arith.mulf %134, %136 : vector<1x32xf32>
    %140 = arith.addf %138, %139 : vector<1x32xf32>
    %141 = math.tanh %140 : vector<1x32xf32>
    %142 = arith.mulf %137, %141 : vector<1x32xf32>
    %c7_i32 = arith.constant 7 : i32
    %143 = arith.index_cast %c7_i32 : i32 to index
    %c0_32 = arith.constant 0 : index
    %144 = vector.load %arg9[%143, %c0_32] : memref<8x128xf32, #tpu.memory_space<vmem>>, vector<1x128xf32>
    %cst_33 = arith.constant dense<0.000000e+00> : vector<1x128xf32>
    %145 = tpu.matmul %142, %0, %cst_33 {dimension_numbers = #tpu.dot_dimension_numbers<[1], [0], [0], [1], [0, 0, 1, 1], [], []>} : vector<1x32xf32>, vector<32x128xf32>, vector<1x128xf32> -> vector<1x128xf32>
    %146 = arith.addf %144, %145 : vector<1x128xf32>
    %147 = arith.negf %146 : vector<1x128xf32>
    %148 = math.exp %147 : vector<1x128xf32>
    %cst_34 = arith.constant 1.000000e+00 : f32
    %149 = vector.broadcast %cst_34 : f32 to vector<1x128xf32>
    %150 = arith.addf %149, %148 : vector<1x128xf32>
    %151 = arith.divf %149, %150 : vector<1x128xf32>
    %152 = math.tanh %146 : vector<1x128xf32>
    %153 = vector.extract_strided_slice %151 {offsets = [0, 0], sizes = [1, 32], strides = [1, 1]} : vector<1x128xf32> to vector<1x32xf32>
    %154 = vector.extract_strided_slice %151 {offsets = [0, 32], sizes = [1, 32], strides = [1, 1]} : vector<1x128xf32> to vector<1x32xf32>
    %155 = vector.extract_strided_slice %152 {offsets = [0, 64], sizes = [1, 32], strides = [1, 1]} : vector<1x128xf32> to vector<1x32xf32>
    %156 = vector.extract_strided_slice %151 {offsets = [0, 96], sizes = [1, 32], strides = [1, 1]} : vector<1x128xf32> to vector<1x32xf32>
    %157 = arith.mulf %154, %140 : vector<1x32xf32>
    %158 = arith.mulf %153, %155 : vector<1x32xf32>
    %159 = arith.addf %157, %158 : vector<1x32xf32>
    %160 = math.tanh %159 : vector<1x32xf32>
    %161 = arith.mulf %156, %160 : vector<1x32xf32>
    %c8_i32 = arith.constant 8 : i32
    %c0_35 = arith.constant 0 : index
    %c0_36 = arith.constant 0 : index
    %162 = vector.load %arg4[%c0_35, %c0_36] : memref<32x32xf32, #tpu.memory_space<vmem>>, vector<32x32xf32>
    %cst_37 = arith.constant dense<0.000000e+00> : vector<1x32xf32>
    %163 = tpu.matmul %161, %162, %cst_37 {dimension_numbers = #tpu.dot_dimension_numbers<[1], [0], [0], [1], [0, 0, 1, 1], [], []>} : vector<1x32xf32>, vector<32x32xf32>, vector<1x32xf32> -> vector<1x32xf32>
    %c0_38 = arith.constant 0 : index
    %c0_39 = arith.constant 0 : index
    %164 = vector.load %arg5[%c0_38, %c0_39] : memref<1x32xf32, #tpu.memory_space<vmem>>, vector<1x32xf32>
    %165 = arith.addf %163, %164 : vector<1x32xf32>
    %c0_40 = arith.constant 0 : index
    %c0_41 = arith.constant 0 : index
    %166 = vector.load %arg6[%c0_40, %c0_41] : memref<32x8xf32, #tpu.memory_space<vmem>>, vector<32x8xf32>
    %cst_42 = arith.constant dense<0.000000e+00> : vector<1x8xf32>
    %167 = tpu.matmul %165, %166, %cst_42 {dimension_numbers = #tpu.dot_dimension_numbers<[1], [0], [0], [1], [0, 0, 1, 1], [], []>} : vector<1x32xf32>, vector<32x8xf32>, vector<1x8xf32> -> vector<1x8xf32>
    %c0_43 = arith.constant 0 : index
    %c0_44 = arith.constant 0 : index
    %168 = vector.load %arg7[%c0_43, %c0_44] : memref<1x8xf32, #tpu.memory_space<vmem>>, vector<1x8xf32>
    %169 = arith.addf %167, %168 : vector<1x8xf32>
    %c0_45 = arith.constant 0 : index
    %c0_46 = arith.constant 0 : index
    %170 = vector.load %arg8[%c0_45, %c0_46] : memref<1x8xf32, #tpu.memory_space<vmem>>, vector<1x8xf32>
    tpu.vector_store %arg8[%c0_45, %c0_46], %169 {strides = array<i32>} : memref<1x8xf32, #tpu.memory_space<vmem>>, vector<1x8xf32>,
    return
  }
}

</mosaic_0001>

<bundles_post_ra>
// kernel: tpu_custom_call.1
= control target key start
LH: loop header
LB: loop body
LE: loop exit
PB: predicated region body
PF: predicated region fallthrough
CT: control target
= control target key end

     0   :  { %13 = vsyncpa [#allocation4], 0  ;;  %s1760_s0 = inlined_call_operand.vmem [shape: f32[8,16], index: 0, kind: input, shape index: {}]   ;;  %s1761_s1 = inlined_call_operand.hbm [shape: f32[16,128], index: 1, kind: input, shape index: {}]   ;;  %s1762_s2 = inlined_call_operand.vmem [shape: f32[32,128], index: 2, kind: input, shape index: {}]   ;;  %s1763_s3 = inlined_call_operand.vmem [shape: f32[1,128], index: 3, kind: input, shape index: {}]   ;;  %s1764_s4 = inlined_call_operand.hbm [shape: f32[32,32], index: 4, kind: input, shape index: {}]   ;;  %s1765_s5 = inlined_call_operand.vmem [shape: f32[1,32], index: 5, kind: input, shape index: {}]   ;;  %s1766_s6 = inlined_call_operand.vmem [shape: f32[32,8], index: 6, kind: input, shape index: {}]   ;;  %s1767_s7 = inlined_call_operand.vmem [shape: f32[1,8], index: 7, kind: input, shape index: {}]   ;;  %s1768_s8 = inlined_call_operand.hbm [shape: f32[1,8], index: 8, kind: output, shape index: {}]  }
   0x1   :  { %14 = vsyncpa [#allocation7], 0 }
   0x2   :  { %15 = vsyncpa [#allocation5], 0  ;;  %s1528_s27 = smov [#allocation3]   ;;  %s1456_s9 = scalar_lea.hbm %s1761_s1, 256 }
   0x3   :  { %s23_s28 = sshll.u32 %s1528_s27, 4  ;;  %p1457_p0 = scmp.ne.s32.totalorder %s1761_s1, %s1456_s9  ;;  %s24_s28 = int_to_ptr.vmem [resolvable:$true] %s23_s28 }
   0x4   :  { %p1460_p1 = scmp.lt.u32.totalorder %s1456_s9, %s1761_s1 }
   0x6   :  { %p1462_p2 = pnand %p1460_p1, %p1457_p0 }
   0x8   :  { %1465 = shalt.err (!%p1462_p2)
}
   0x9   :  { %s1466_s14 = scalar_lea.vmem %s24_s28, 256  ;;  %p1471_p4 = scmp.lt.s32.totalorder %s24_s28, %s24_s28 }
   0xa   :  { %p1467_p3 = scmp.ne.s32.totalorder %s24_s28, %s1466_s14  ;;  %p1472_p5 = scmp.lt.s32.totalorder %s1466_s14, %s1466_s14 }
   0xc   :  { %p1473_p6 = por %p1472_p5, %p1471_p4 }
   0xe   :  { %p1474_p7 = pnand %p1473_p6, %p1467_p3 }
  0x10   :  { %1477 = shalt.err (!%p1474_p7)
}
  0x11   :  { %s1529_s15 = smov 128   ;;  %s1530_s16 = smov 8  }
  0x12   :  { %29 = dma.hbm_to_vmem [thread:$0]  %s1761_s1, 256, %s24_s28, [#allocation4], %s1529_s15, %s1529_s15, %s1530_s16  }
  0x13   :  { %s1531_s19 = smov [#allocation6]   ;;  %s1478_s23 = scalar_lea.hbm %s1764_s4, 512 }
  0x14   :  { %s39_s20 = sshll.u32 %s1531_s19, 4  ;;  %p1479_p8 = scmp.ne.s32.totalorder %s1764_s4, %s1478_s23  ;;  %s40_s20 = int_to_ptr.vmem [resolvable:$true] %s39_s20 }
  0x15   :  { %p1482_p9 = scmp.lt.u32.totalorder %s1478_s23, %s1764_s4 }
  0x17   :  { %p1484_p10 = pnand %p1482_p9, %p1479_p8 }
  0x19   :  { %1487 = shalt.err (!%p1484_p10)
}
  0x1a   :  { %s1488_s29 = scalar_lea.vmem %s40_s20, 512  ;;  %p1493_p12 = scmp.lt.s32.totalorder %s40_s20, %s40_s20 }
  0x1b   :  { %p1489_p11 = scmp.ne.s32.totalorder %s40_s20, %s1488_s29  ;;  %p1494_p13 = scmp.lt.s32.totalorder %s1488_s29, %s1488_s29 }
  0x1d   :  { %p1495_p0 = por %p1494_p13, %p1493_p12 }
  0x1f   :  { %p1496_p1 = pnand %p1495_p0, %p1489_p11 }
  0x21   :  { %1499 = shalt.err (!%p1496_p1)
}
  0x22   :  { %45 = dma.hbm_to_vmem [thread:$0]  %s1764_s4, 512, %s40_s20, [#allocation7], %s1529_s15, %s1529_s15, %s1530_s16  }
  0x23   :  { %1522 = dma.done.wait [#allocation4], 256  }
  0x24   :  { %1523 = vsyncadd [#allocation4], 4294967040 }
  0x25   :  { %1524 = dma.done.wait [#allocation7], 512  }
  0x26   :  { %1525 = vsyncadd [#allocation7], 4294966784  ;;  %v1532_v0 = vmov 0.0|0.0   ;;  %vm1533_vm0 = vmmov 0   ;;  %v1534_v1 = vmov 0.0   ;;  %v63_v2 = vld [vmem:[#allocation3] sm:$0xff] }
  0x27   :  { %1319 = vmatprep.subr.bf16.mxu0 %v1532_v0  ;;  %1206 = vmatprep.mubr.msk.f32.mxu0 %vm1533_vm0, %v1534_v1  ;;  %v64_v3 = vld [vmem:[#allocation3 + $0x8] sm:$0xff]  ;;  %v58_v5 = vld [vmem:[%s1762_s2] sm:$0xff]  ;;  %v59_v6 = vld [vmem:[%s1762_s2 + $0x8] sm:$0xff]  ;;  %vm72_vm1 = vcmask 130048   ;;  %s1535_s17 = smov 64   ;;  %vm148_vm2 = vcmask 261120  }
  0x28   :  { %1322 = vmatprep.subr.bf16.mxu1 %v1532_v0  ;;  %1217 = vmatprep.mubr.msk.f32.mxu1 %vm1533_vm0, %v1534_v1  ;;  %v1320_v4 = vpack.c.bf16 %v64_v3, %v63_v2  ;;  %v60_v7 = vld [vmem:[%s1762_s2 + $0x10] sm:$0xff]  ;;  %v1622_v8 = vpack.c.bf16 %v59_v6, %v58_v5  ;;  %v61_v9 = vld [vmem:[%s1762_s2 + $0x18] sm:$0xff]  ;;  %v62_v10 = vld [vmem:[%s1760_s0] sm:$0xff]  ;;  %s1537_s28 = smov [#allocation8]   ;;  %vm1112_vm3 = vcmask 57344  }
  0x29   :  { %v1631_v11 = vpack.c.bf16 %v61_v9, %v60_v7  ;;  %v1130_v12 = vld [vmem:[%s1763_s3] ss:$0 sm:$0xff]  ;;  %s1536_s3 = smov 32   ;;  %s1120_s4 = sshll.u32 %s1537_s28, 4  ;;  %s1121_s4 = int_to_ptr.vmem [resolvable:$true] %s1120_s4 }
  0x2a   :  { %1321 = vmatpush3.bf16.msra.mxu0 %v1320_v4  ;;  %1324 = vmatpush3.bf16.msra.mxu1 %v1622_v8  ;;  %p1505_p3 = scmp.lt.s32.totalorder %s1121_s4, %s1121_s4 }
  0x2b   :  { %1328 = vmatprep.subr.bf16.mxu0 %v1532_v0  ;;  %1325 = vmatprep.subr.bf16.mxu1 %v1532_v0 }
  0x2d   :  { %1207 = vmatmul.mubr.msk.f32.vlgmr.msra.gmra.mrb[0].mxu0 %vm72_vm1, %v62_v10 }
  0x2e   :  { %1330 = vmatpush3.bf16.msra.mxu0 %v1622_v8  ;;  %1228 = vmatprep.mubr.msk.f32.mxu0 %vm1533_vm0, %v1534_v1 }
  0x2f   :  { %1327 = vmatpush3.bf16.msra.mxu1 %v1631_v11  ;;  %1331 = vmatprep.subr.bf16.mxu0 %v1532_v0 }
  0x30   :  { %1334 = vmatprep.subr.bf16.mxu1 %v1532_v0 }
  0x32   :  { %1218 = vmatmul.mubr.f32.vlgmr.msra.gmra.mrb[0].mxu1 %v1534_v1  ;;  %1333 = vmatpush3.bf16.msra.mxu0 %v1631_v11 }
  0x33   :  { %1336 = vmatpush3.bf16.msra.mxu1 %v1622_v8  ;;  %1239 = vmatprep.mubr.msk.f32.mxu1 %vm1533_vm0, %v1534_v1 }
  0x34   :  { %1337 = vmatprep.subr.bf16.mxu1 %v1532_v0  ;;  %1340 = vmatprep.subr.bf16.mxu0 %v1532_v0 }
  0x37   :  { %1339 = vmatpush3.bf16.msra.mxu1 %v1631_v11 }
  0x38   :  { %1346 = vmatprep.subr.bf16.mxu1 %v1532_v0 }
 0x100   :  { %v142_v13 = vpop.f32.mrb[0].mxu0 }
 0x101   :  { %v143_v14 = vadd.f32 %v1130_v12, %v142_v13  ;;  %v1208_v15 = vpop.f32.mrb[1].mxu0 }
 0x103   :  { %146 = vst [vmem:[#allocation2] sm:$0xff] %v143_v14 }
 0x105   :  { %v218_v16 = vpop.f32.mrb[0].mxu1 }
 0x106   :  { %v1219_v17 = vpop.f32.mrb[1].mxu1 }
 0x10a   :  { %v147_v18 = vld [vmem:[#allocation2] sm:$0x1]  ;;  %v247_v34 = vld [vmem:[#allocation2 + $0x1] sm:$0x1]  ;;  %v348_v52 = vld [vmem:[#allocation2 + $0x2] sm:$0x1] }
 0x10b   :  { %v222_v19 = vadd.f32 %v218_v16, %v147_v18  ;;  %v449_v9 = vld [vmem:[#allocation2 + $0x3] sm:$0x1] }
 0x10d   :  { %1392 = vtanh.f32 %v222_v19  ;;  %v1132_v21 = vmul.f32 -1.442695, %v222_v19 }
 0x10f   :  { %1394 = vpow2.f32 %v1132_v21 }
 0x117   :  { %v1393_v20 = vpop.eup %1392 }
 0x118   :  { %232 = vrot.lane.b32.xlu0 %v1393_v20, %s1535_s17 }
 0x119   :  { %v1395_v22 = vpop.eup %1394 }
 0x11a   :  { %v226_v23 = vadd.f32 1.0, %v1395_v22 }
 0x11c   :  { %1396 = vrcp.f32 %v226_v23 }
 0x126   :  { %v1397_v24 = vpop.eup %1396 }
 0x127   :  { %v230_v27 = vmul.f32 0.0, %v1397_v24 }
 0x18a   :  { %v233_v25 = vpop.permute.xlu0 %232 }
 0x18b   :  { %v235_v26 = vmul.f32 %v1397_v24, %v233_v25 }
 0x18d   :  { %237 = vrot.lane.b32.xlu0 %v235_v26, %s1536_s3 }
 0x1ff   :  { %v238_v28 = vpop.permute.xlu0 %237 }
 0x200   :  { %v240_v29 = vadd.f32 %v238_v28, %v230_v27  ;;  %v550_v28 = vld [vmem:[#allocation2 + $0x4] sm:$0x1] }
 0x202   :  { %1398 = vtanh.f32 %v240_v29 }
 0x20c   :  { %v1399_v30 = vpop.eup %1398 }
 0x20d   :  { %243 = vrot.lane.b32.xlu1 %v1399_v30, %s1535_s17 }
 0x27f   :  { %v244_v31 = vpop.permute.xlu1 %243 }
 0x280   :  { %v246_v32 = vmul.f32 %v1397_v24, %v244_v31 }
 0x282   :  { %249 = vrot.lane.b32.xlu1 %v246_v32, %s1536_s3 }
 0x2f4   :  { %v250_v33 = vpop.permute.xlu1 %249 }
 0x2f5   :  { %1229 = vmatmul.mubr.msk.f32.vlgmr.msra.gmra.mrb[2].mxu0 %vm148_vm2, %v250_v33 }
 0x2f6   :  { %1342 = vmatpush3.bf16.msra.mxu0 %v1622_v8  ;;  %1250 = vmatprep.mubr.msk.f32.mxu0 %vm1533_vm0, %v1534_v1 }
 0x2f7   :  { %1343 = vmatprep.subr.bf16.mxu0 %v1532_v0 }
 0x2fa   :  { %1345 = vmatpush3.bf16.msra.mxu0 %v1631_v11 }
 0x2fb   :  { %1352 = vmatprep.subr.bf16.mxu0 %v1532_v0 }
 0x3c8   :  { %v319_v35 = vpop.f32.mrb[2].mxu0 }
 0x3c9   :  { %v323_v36 = vadd.f32 %v319_v35, %v247_v34  ;;  %v1230_v37 = vpop.f32.mrb[3].mxu0 }
 0x3cb   :  { %1400 = vtanh.f32 %v323_v36  ;;  %v1134_v39 = vmul.f32 -1.442695, %v323_v36 }
 0x3cd   :  { %1402 = vpow2.f32 %v1134_v39 }
 0x3d5   :  { %v1401_v38 = vpop.eup %1400 }
 0x3d6   :  { %333 = vrot.lane.b32.xlu0 %v1401_v38, %s1535_s17 }
 0x3d7   :  { %v1403_v40 = vpop.eup %1402 }
 0x3d8   :  { %v327_v41 = vadd.f32 1.0, %v1403_v40 }
 0x3da   :  { %1404 = vrcp.f32 %v327_v41 }
 0x3e4   :  { %v1405_v42 = vpop.eup %1404 }
 0x3e5   :  { %v331_v45 = vmul.f32 %v1405_v42, %v240_v29 }
 0x448   :  { %v334_v43 = vpop.permute.xlu0 %333 }
 0x449   :  { %v336_v44 = vmul.f32 %v1405_v42, %v334_v43 }
 0x44b   :  { %338 = vrot.lane.b32.xlu1 %v336_v44, %s1536_s3 }
 0x4bd   :  { %v339_v46 = vpop.permute.xlu1 %338 }
 0x4be   :  { %v341_v47 = vadd.f32 %v339_v46, %v331_v45  ;;  %v651_v46 = vld [vmem:[#allocation2 + $0x5] sm:$0x1] }
 0x4c0   :  { %1406 = vtanh.f32 %v341_v47 }
 0x4ca   :  { %v1407_v48 = vpop.eup %1406 }
 0x4cb   :  { %344 = vrot.lane.b32.xlu0 %v1407_v48, %s1535_s17 }
 0x53d   :  { %v345_v49 = vpop.permute.xlu0 %344 }
 0x53e   :  { %v347_v50 = vmul.f32 %v1405_v42, %v345_v49 }
 0x540   :  { %350 = vrot.lane.b32.xlu1 %v347_v50, %s1536_s3 }
 0x5b2   :  { %v351_v51 = vpop.permute.xlu1 %350 }
 0x5b3   :  { %1240 = vmatmul.mubr.msk.f32.vlgmr.msra.gmra.mrb[2].mxu1 %vm148_vm2, %v351_v51 }
 0x5b4   :  { %1348 = vmatpush3.bf16.msra.mxu1 %v1622_v8  ;;  %1261 = vmatprep.mubr.msk.f32.mxu1 %vm1533_vm0, %v1534_v1 }
 0x5b5   :  { %1349 = vmatprep.subr.bf16.mxu1 %v1532_v0 }
 0x5b8   :  { %1351 = vmatpush3.bf16.msra.mxu1 %v1631_v11 }
 0x5b9   :  { %1358 = vmatprep.subr.bf16.mxu1 %v1532_v0 }
 0x686   :  { %v420_v53 = vpop.f32.mrb[2].mxu1 }
 0x687   :  { %v424_v54 = vadd.f32 %v420_v53, %v348_v52  ;;  %v1241_v55 = vpop.f32.mrb[3].mxu1 }
 0x689   :  { %1408 = vtanh.f32 %v424_v54  ;;  %v1136_v57 = vmul.f32 -1.442695, %v424_v54 }
 0x68b   :  { %1410 = vpow2.f32 %v1136_v57 }
 0x693   :  { %v1409_v56 = vpop.eup %1408 }
 0x694   :  { %434 = vrot.lane.b32.xlu0 %v1409_v56, %s1535_s17 }
 0x695   :  { %v1411_v58 = vpop.eup %1410 }
 0x696   :  { %v428_v59 = vadd.f32 1.0, %v1411_v58 }
 0x698   :  { %1412 = vrcp.f32 %v428_v59 }
 0x6a2   :  { %v1413_v60 = vpop.eup %1412 }
 0x6a3   :  { %v432_v63 = vmul.f32 %v1413_v60, %v341_v47 }
 0x706   :  { %v435_v61 = vpop.permute.xlu0 %434 }
 0x707   :  { %v437_v62 = vmul.f32 %v1413_v60, %v435_v61 }
 0x709   :  { %439 = vrot.lane.b32.xlu1 %v437_v62, %s1536_s3  ;;  %v752_v62 = vld [vmem:[#allocation2 + $0x6] sm:$0x1] }
 0x77b   :  { %v440_v2 = vpop.permute.xlu1 %439 }
 0x77c   :  { %v442_v3 = vadd.f32 %v440_v2, %v432_v63 }
 0x77e   :  { %1414 = vtanh.f32 %v442_v3 }
 0x788   :  { %v1415_v4 = vpop.eup %1414 }
 0x789   :  { %445 = vrot.lane.b32.xlu0 %v1415_v4, %s1535_s17 }
 0x7fb   :  { %v446_v5 = vpop.permute.xlu0 %445 }
 0x7fc   :  { %v448_v6 = vmul.f32 %v1413_v60, %v446_v5 }
 0x7fe   :  { %451 = vrot.lane.b32.xlu1 %v448_v6, %s1536_s3 }
 0x870   :  { %v452_v7 = vpop.permute.xlu1 %451 }
 0x871   :  { %1251 = vmatmul.mubr.msk.f32.vlgmr.msra.gmra.mrb[4].mxu0 %vm148_vm2, %v452_v7 }
 0x872   :  { %1354 = vmatpush3.bf16.msra.mxu0 %v1622_v8  ;;  %1272 = vmatprep.mubr.msk.f32.mxu0 %vm1533_vm0, %v1534_v1 }
 0x873   :  { %1355 = vmatprep.subr.bf16.mxu0 %v1532_v0 }
 0x876   :  { %1357 = vmatpush3.bf16.msra.mxu0 %v1631_v11 }
 0x877   :  { %1364 = vmatprep.subr.bf16.mxu0 %v1532_v0 }
 0x944   :  { %v521_v10 = vpop.f32.mrb[4].mxu0 }
 0x945   :  { %v525_v12 = vadd.f32 %v521_v10, %v449_v9  ;;  %v1252_v13 = vpop.f32.mrb[5].mxu0 }
 0x947   :  { %1416 = vtanh.f32 %v525_v12  ;;  %v1138_v15 = vmul.f32 -1.442695, %v525_v12 }
 0x949   :  { %1418 = vpow2.f32 %v1138_v15 }
 0x951   :  { %v1417_v14 = vpop.eup %1416 }
 0x952   :  { %535 = vrot.lane.b32.xlu0 %v1417_v14, %s1535_s17 }
 0x953   :  { %v1419_v16 = vpop.eup %1418 }
 0x954   :  { %v529_v17 = vadd.f32 1.0, %v1419_v16 }
 0x956   :  { %1420 = vrcp.f32 %v529_v17 }
 0x960   :  { %v1421_v18 = vpop.eup %1420 }
 0x961   :  { %v533_v21 = vmul.f32 %v1421_v18, %v442_v3 }
 0x9c4   :  { %v536_v19 = vpop.permute.xlu0 %535 }
 0x9c5   :  { %v538_v20 = vmul.f32 %v1421_v18, %v536_v19 }
 0x9c7   :  { %540 = vrot.lane.b32.xlu1 %v538_v20, %s1536_s3  ;;  %v853_v20 = vld [vmem:[#allocation2 + $0x7] sm:$0x1] }
 0xa39   :  { %v541_v22 = vpop.permute.xlu1 %540 }
 0xa3a   :  { %v543_v23 = vadd.f32 %v541_v22, %v533_v21 }
 0xa3c   :  { %1422 = vtanh.f32 %v543_v23 }
 0xa46   :  { %v1423_v24 = vpop.eup %1422 }
 0xa47   :  { %546 = vrot.lane.b32.xlu0 %v1423_v24, %s1535_s17 }
 0xab9   :  { %v547_v25 = vpop.permute.xlu0 %546 }
 0xaba   :  { %v549_v26 = vmul.f32 %v1421_v18, %v547_v25 }
 0xabc   :  { %552 = vrot.lane.b32.xlu1 %v549_v26, %s1536_s3 }
 0xb2e   :  { %v553_v27 = vpop.permute.xlu1 %552 }
 0xb2f   :  { %1262 = vmatmul.mubr.msk.f32.vlgmr.msra.gmra.mrb[4].mxu1 %vm148_vm2, %v553_v27 }
 0xb30   :  { %1360 = vmatpush3.bf16.msra.mxu1 %v1622_v8  ;;  %1283 = vmatprep.mubr.msk.f32.mxu1 %vm1533_vm0, %v1534_v1 }
 0xb31   :  { %1361 = vmatprep.subr.bf16.mxu1 %v1532_v0 }
 0xb34   :  { %1363 = vmatpush3.bf16.msra.mxu1 %v1631_v11 }
 0xb35   :  { %1370 = vmatprep.subr.bf16.mxu1 %v1532_v0 }
 0xc02   :  { %v622_v29 = vpop.f32.mrb[4].mxu1 }
 0xc03   :  { %v626_v30 = vadd.f32 %v622_v29, %v550_v28  ;;  %v1263_v31 = vpop.f32.mrb[5].mxu1 }
 0xc05   :  { %1424 = vtanh.f32 %v626_v30  ;;  %v1140_v33 = vmul.f32 -1.442695, %v626_v30 }
 0xc07   :  { %1426 = vpow2.f32 %v1140_v33  ;;  %v954_v33 = vld [vmem:[#allocation6] sm:$0xff] }
 0xc0f   :  { %v1425_v32 = vpop.eup %1424 }
 0xc10   :  { %636 = vrot.lane.b32.xlu0 %v1425_v32, %s1535_s17 }
 0xc11   :  { %v1427_v34 = vpop.eup %1426 }
 0xc12   :  { %v630_v35 = vadd.f32 1.0, %v1427_v34  ;;  %v955_v34 = vld [vmem:[#allocation6 + $0x8] sm:$0xff] }
 0xc14   :  { %1428 = vrcp.f32 %v630_v35  ;;  %v956_v35 = vld [vmem:[#allocation6 + $0x10] sm:$0xff] }
 0xc1e   :  { %v1429_v36 = vpop.eup %1428 }
 0xc1f   :  { %v634_v39 = vmul.f32 %v1429_v36, %v543_v23 }
 0xc82   :  { %v637_v37 = vpop.permute.xlu0 %636 }
 0xc83   :  { %v639_v38 = vmul.f32 %v1429_v36, %v637_v37  ;;  %v957_v37 = vld [vmem:[#allocation6 + $0x18] sm:$0xff] }
 0xc85   :  { %641 = vrot.lane.b32.xlu1 %v639_v38, %s1536_s3  ;;  %v1374_v38 = vpack.c.bf16 %v957_v37, %v956_v35 }
 0xcf7   :  { %v642_v40 = vpop.permute.xlu1 %641 }
 0xcf8   :  { %v644_v41 = vadd.f32 %v642_v40, %v634_v39  ;;  %v1034_v40 = vld [vmem:[%s1766_s6] sm:$0xff] }
 0xcfa   :  { %1430 = vtanh.f32 %v644_v41 }
 0xd04   :  { %v1431_v42 = vpop.eup %1430 }
 0xd05   :  { %647 = vrot.lane.b32.xlu0 %v1431_v42, %s1535_s17 }
 0xd77   :  { %v648_v43 = vpop.permute.xlu0 %647 }
 0xd78   :  { %v650_v44 = vmul.f32 %v1429_v36, %v648_v43  ;;  %v1371_v36 = vpack.c.bf16 %v955_v34, %v954_v33 }
 0xd7a   :  { %653 = vrot.lane.b32.xlu1 %v650_v44, %s1536_s3 }
 0xdec   :  { %v654_v45 = vpop.permute.xlu1 %653 }
 0xded   :  { %1273 = vmatmul.mubr.msk.f32.vlgmr.msra.gmra.mrb[6].mxu0 %vm148_vm2, %v654_v45 }
 0xdee   :  { %1366 = vmatpush3.bf16.msra.mxu0 %v1622_v8  ;;  %1294 = vmatprep.mubr.msk.f32.mxu0 %vm1533_vm0, %v1534_v1 }
 0xdef   :  { %1367 = vmatprep.subr.bf16.mxu0 %v1532_v0 }
 0xdf2   :  { %1369 = vmatpush3.bf16.msra.mxu0 %v1631_v11 }
 0xdf3   :  { %1376 = vmatprep.subr.bf16.mxu0 %v1532_v0 }
 0xec0   :  { %v723_v47 = vpop.f32.mrb[6].mxu0 }
 0xec1   :  { %v727_v48 = vadd.f32 %v723_v47, %v651_v46  ;;  %v1274_v49 = vpop.f32.mrb[7].mxu0  ;;  %v1036_v46 = vld [vmem:[%s1766_s6 + $0x10] sm:$0xff]  ;;  %v1037_v47 = vld [vmem:[%s1766_s6 + $0x18] sm:$0xff] }
 0xec3   :  { %1432 = vtanh.f32 %v727_v48  ;;  %v1142_v51 = vmul.f32 -1.442695, %v727_v48  ;;  %v1380_v48 = vpack.c.bf16 %v1037_v47, %v1036_v46 }
 0xec5   :  { %1434 = vpow2.f32 %v1142_v51 }
 0xecd   :  { %v1433_v50 = vpop.eup %1432 }
 0xece   :  { %737 = vrot.lane.b32.xlu0 %v1433_v50, %s1535_s17 }
 0xecf   :  { %v1435_v8 = vpop.eup %1434 }
 0xed0   :  { %v731_v52 = vadd.f32 1.0, %v1435_v8  ;;  %v1038_v8 = vld [vmem:[%s1767_s7] sm:$0x1] }
 0xed2   :  { %1436 = vrcp.f32 %v731_v52 }
 0xedc   :  { %v1437_v53 = vpop.eup %1436 }
 0xedd   :  { %v735_v11 = vmul.f32 %v1437_v53, %v644_v41  ;;  %v1035_v41 = vld [vmem:[%s1766_s6 + $0x8] sm:$0xff]  ;;  %s1500_s6 = scalar_lea.vmem %s1121_s4, 16 }
 0xede   :  { %v1377_v42 = vpack.c.bf16 %v1035_v41, %v1034_v40  ;;  %p1501_p2 = scmp.ne.s32.totalorder %s1121_s4, %s1500_s6 }
 0xf40   :  { %v738_v54 = vpop.permute.xlu0 %737 }
 0xf41   :  { %v740_v55 = vmul.f32 %v1437_v53, %v738_v54 }
 0xf43   :  { %742 = vrot.lane.b32.xlu1 %v740_v55, %s1536_s3 }
 0xfb5   :  { %v743_v56 = vpop.permute.xlu1 %742 }
 0xfb6   :  { %v745_v57 = vadd.f32 %v743_v56, %v735_v11 }
 0xfb8   :  { %1438 = vtanh.f32 %v745_v57 }
 0xfc2   :  { %v1439_v58 = vpop.eup %1438 }
 0xfc3   :  { %748 = vrot.lane.b32.xlu0 %v1439_v58, %s1535_s17 }
0x1035   :  { %v749_v59 = vpop.permute.xlu0 %748 }
0x1036   :  { %v751_v60 = vmul.f32 %v1437_v53, %v749_v59 }
0x1038   :  { %754 = vrot.lane.b32.xlu1 %v751_v60, %s1536_s3 }
0x10aa   :  { %v755_v61 = vpop.permute.xlu1 %754 }
0x10ab   :  { %1284 = vmatmul.mubr.msk.f32.vlgmr.msra.gmra.mrb[6].mxu1 %vm148_vm2, %v755_v61 }
0x10ac   :  { %1305 = vmatprep.mubr.msk.f32.mxu1 %vm1533_vm0, %v1534_v1  ;;  %1372 = vmatpush3.bf16.msra.mxu1 %v1371_v36 }
0x10ad   :  { %1373 = vmatprep.subr.bf16.mxu1 %v1532_v0 }
0x10b0   :  { %1375 = vmatpush3.bf16.msra.mxu1 %v1374_v38 }
0x117e   :  { %v824_v63 = vpop.f32.mrb[6].mxu1 }
0x117f   :  { %v828_v2 = vadd.f32 %v824_v63, %v752_v62  ;;  %v1285_v3 = vpop.f32.mrb[7].mxu1 }
0x1181   :  { %1440 = vtanh.f32 %v828_v2  ;;  %v1144_v5 = vmul.f32 -1.442695, %v828_v2 }
0x1183   :  { %1442 = vpow2.f32 %v1144_v5 }
0x118b   :  { %v1441_v4 = vpop.eup %1440 }
0x118c   :  { %838 = vrot.lane.b32.xlu0 %v1441_v4, %s1535_s17 }
0x118d   :  { %v1443_v6 = vpop.eup %1442 }
0x118e   :  { %v832_v7 = vadd.f32 1.0, %v1443_v6 }
0x1190   :  { %1444 = vrcp.f32 %v832_v7 }
0x119a   :  { %v1445_v9 = vpop.eup %1444 }
0x119b   :  { %v836_v13 = vmul.f32 %v1445_v9, %v745_v57 }
0x11fe   :  { %v839_v10 = vpop.permute.xlu0 %838 }
0x11ff   :  { %v841_v12 = vmul.f32 %v1445_v9, %v839_v10 }
0x1201   :  { %843 = vrot.lane.b32.xlu1 %v841_v12, %s1536_s3 }
0x1273   :  { %v844_v14 = vpop.permute.xlu1 %843 }
0x1274   :  { %v846_v15 = vadd.f32 %v844_v14, %v836_v13 }
0x1276   :  { %1446 = vtanh.f32 %v846_v15 }
0x1280   :  { %v1447_v16 = vpop.eup %1446 }
0x1281   :  { %849 = vrot.lane.b32.xlu0 %v1447_v16, %s1535_s17 }
0x12f3   :  { %v850_v17 = vpop.permute.xlu0 %849 }
0x12f4   :  { %v852_v18 = vmul.f32 %v1445_v9, %v850_v17 }
0x12f6   :  { %855 = vrot.lane.b32.xlu1 %v852_v18, %s1536_s3 }
0x1368   :  { %v856_v19 = vpop.permute.xlu1 %855 }
0x1369   :  { %1295 = vmatmul.mubr.msk.f32.vlgmr.msra.gmra.mrb[8].mxu0 %vm148_vm2, %v856_v19 }
0x136a   :  { %1316 = vmatprep.mubr.msk.f32.mxu0 %vm1533_vm0, %v1534_v1  ;;  %1378 = vmatpush3.bf16.msra.mxu0 %v1377_v42 }
0x136b   :  { %1379 = vmatprep.subr.bf16.mxu0 %v1532_v0  ;;  %v958_v0 = vld [vmem:[%s1765_s5] sm:$0x1]  ;;  %s1504_s5 = scalar_lea.vmem %s1121_s4, 32 }
0x136c   :  { %p1506_p4 = scmp.lt.s32.totalorder %s1504_s5, %s1500_s6 }
0x136e   :  { %1381 = vmatpush3.bf16.msra.mxu0 %v1380_v48  ;;  %p1507_p5 = por %p1506_p4, %p1505_p3 }
0x1370   :  { %p1508_p6 = pnand %p1507_p5, %p1501_p2 }
0x143c   :  { %v925_v21 = vpop.f32.mrb[8].mxu0 }
0x143d   :  { %v929_v22 = vadd.f32 %v925_v21, %v853_v20  ;;  %v1296_v23 = vpop.f32.mrb[9].mxu0 }
0x143f   :  { %1448 = vtanh.f32 %v929_v22  ;;  %v1146_v25 = vmul.f32 -1.442695, %v929_v22 }
0x1441   :  { %1450 = vpow2.f32 %v1146_v25 }
0x1449   :  { %v1449_v24 = vpop.eup %1448 }
0x144a   :  { %939 = vrot.lane.b32.xlu0 %v1449_v24, %s1535_s17 }
0x144b   :  { %v1451_v26 = vpop.eup %1450 }
0x144c   :  { %v933_v27 = vadd.f32 1.0, %v1451_v26 }
0x144e   :  { %1452 = vrcp.f32 %v933_v27 }
0x1458   :  { %v1453_v28 = vpop.eup %1452 }
0x1459   :  { %v937_v31 = vmul.f32 %v1453_v28, %v846_v15 }
0x14bc   :  { %v940_v29 = vpop.permute.xlu0 %939 }
0x14bd   :  { %v942_v30 = vmul.f32 %v1453_v28, %v940_v29 }
0x14bf   :  { %944 = vrot.lane.b32.xlu1 %v942_v30, %s1536_s3 }
0x1531   :  { %v945_v1 = vpop.permute.xlu1 %944 }
0x1532   :  { %v947_v32 = vadd.f32 %v945_v1, %v937_v31 }
0x1534   :  { %1454 = vtanh.f32 %v947_v32 }
0x153e   :  { %v1455_v39 = vpop.eup %1454 }
0x153f   :  { %950 = vrot.lane.b32.xlu0 %v1455_v39, %s1535_s17 }
0x15b1   :  { %v951_v43 = vpop.permute.xlu0 %950 }
0x15b2   :  { %v953_v44 = vmul.f32 %v1453_v28, %v951_v43 }
0x15b4   :  { %960 = vrot.lane.b32.xlu1 %v953_v44, %s1536_s3 }
0x1626   :  { %v961_v45 = vpop.permute.xlu1 %960 }
0x1627   :  { %1306 = vmatmul.mubr.msk.f32.vlgmr.msra.gmra.mrb[8].mxu1 %vm148_vm2, %v961_v45 }
0x16fa   :  { %v1030_v49 = vpop.f32.mrb[8].mxu1 }
0x16fb   :  { %v1031_v50 = vadd.f32 %v1030_v49, %v958_v0  ;;  %v1307_v51 = vpop.f32.mrb[9].mxu1 }
0x16fd   :  { %1317 = vmatmul.mubr.msk.f32.vlgmr.msra.gmra.mrb[10].mxu0 %vm148_vm2, %v1031_v50 }
0x17d0   :  { %v1108_v52 = vpop.f32.mrb[10].mxu0 }
0x17d1   :  { %v1109_v53 = vadd.f32 %v1108_v52, %v1038_v8  ;;  %v1318_v54 = vpop.f32.mrb[11].mxu0 }
0x17d3   :  { %1113 = vst.msk [vmem:[#allocation8] sm:$0x1] %vm1112_vm3, %v1109_v53 }
0x17d4   :  { %1511 = shalt.err (!%p1508_p6)
}
0x17d5   :  { %s1512_s7 = scalar_lea.hbm %s1768_s8, 16 }
0x17d6   :  { %p1513_p7 = scmp.ne.s32.totalorder %s1768_s8, %s1512_s7  ;;  %p1516_p8 = scmp.lt.u32.totalorder %s1512_s7, %s1768_s8 }
0x17d8   :  { %p1518_p9 = pnand %p1516_p8, %p1513_p7 }
0x17da   :  { %1521 = shalt.err (!%p1518_p9)
}
0x17db   :  { %1123 = dma.vmem_to_hbm [thread:$0]  %s1121_s4, 16, %s1768_s8, [#allocation5]  }
0x17dc   :  { %1526 = dma.done.wait [#allocation5], 16  }
0x17dd   :  { %1527 = vsyncadd [#allocation5], 4294967280 }
0x17de   :  { %1127 = vsyncpa [#allocation4], 1 }
0x17df   :  { %1128 = vsyncpa [#allocation7], 1 }
0x17e0   :  { %1129 = vsyncpa [#allocation5], 1 }

</bundles_post_ra>
